<compile_context>
chip_gen: v5e
topology: v5e:2x2
jax: 0.10.0
libtpu: 0.0.40
codegen_flags: <defaults>
</compile_context>

<pallas_src>
import functools

import numpy as np
import jax
import jax.numpy as jnp
from jax import lax
from jax.experimental import pallas as pl
from jax.experimental.pallas import tpu as pltpu

_VMEM_LIMIT_BYTES = 32 * 1024 * 1024  # explicit scoped-VMEM budget (v7x-safe)


def _round_up(x, m):
    return ((x + m - 1) // m) * m


# ------------------ fused normalize + pad (preprocess_image) ----------------

def _pick_row_tile(h_pad, h):
    """Largest multiple-of-8 row tile dividing the padded height (preferring
    tiles that do not exceed the valid height)."""
    for t in (512, 256, 128, 64, 32, 16, 8):
        if h_pad % t == 0 and (t <= h or t == 8):
            return t
    return h_pad


def _norm_pad_kernel(x_ref, m_ref, s_ref, o_ref, *, H, W, Wp, TH):
    """Per-(image,channel) row-band: out = (x - mean) * inv_std on valid
    pixels, zeros on the bottom/right padding."""
    ih = pl.program_id(1)
    mean = m_ref[0, 0, 0]
    inv_std = s_ref[0, 0, 0]
    rows = ih * TH + lax.broadcasted_iota(jnp.int32, (TH, W), 0)
    vals = jnp.where(rows < H, (x_ref[0] - mean) * inv_std, 0.0)
    if W == Wp:
        o_ref[0, :, :] = vals
    else:
        o_ref[...] = jnp.zeros_like(o_ref)
        o_ref[0, :, :W] = vals


def normalize_and_pad(images, pixel_mean, pixel_std, size_divisibility):
    """self.normalizer(x) fused with ImageList.from_tensors zero-padding.

    images: (B, C, H, W) f32; pixel_mean/pixel_std: (C,) f32.
    Returns (B, C, Hp, Wp) with Hp/Wp padded up to size_divisibility.
    """
    B, C, H, W = images.shape
    Hp = _round_up(H, size_divisibility)
    Wp = _round_up(W, size_divisibility)
    TH = _pick_row_tile(Hp, H)

    x3 = images.reshape(B * C, H, W).astype(jnp.float32)
    mean = jnp.tile(pixel_mean.astype(jnp.float32), (B,)).reshape(B * C, 1, 1)
    inv_std = jnp.tile((1.0 / pixel_std).astype(jnp.float32), (B,)).reshape(
        B * C, 1, 1)

    max_h_blk = (H - 1) // TH  # clamp fully-out-of-range row blocks
    kernel = functools.partial(_norm_pad_kernel, H=H, W=W, Wp=Wp, TH=TH)

    out = pl.pallas_call(
        kernel,
        out_shape=jax.ShapeDtypeStruct((B * C, Hp, Wp), jnp.float32),
        grid=(B * C, Hp // TH),
        in_specs=[
            # Full-width row band of the unpadded input (ragged edges masked
            # in-kernel; fully-padded bands clamp to the last valid band).
            pl.BlockSpec((1, TH, W),
                         lambda bc, ih: (bc, jnp.minimum(ih, max_h_blk), 0)),
            # Per-(image,channel) scalars, resident across the row-band loop.
            pl.BlockSpec((1, 1, 1), lambda bc, ih: (bc, 0, 0)),
            pl.BlockSpec((1, 1, 1), lambda bc, ih: (bc, 0, 0)),
        ],
        out_specs=pl.BlockSpec((1, TH, Wp), lambda bc, ih: (bc, ih, 0)),
        compiler_params=pltpu.CompilerParams(
            dimension_semantics=("parallel", "parallel"),
            vmem_limit_bytes=_VMEM_LIMIT_BYTES,
        ),
    )(x3, mean, inv_std)
    return out.reshape(B, C, Hp, Wp)


# --------------------- history_transform (Conv2d 1->64) ---------------------

def _conv_matmul_kernel(w_ref, b_ref, p_ref, o_ref):
    # w: (64, 9), p: (9, TILE_P), b: (64, 1) -> o: (64, TILE_P) lane-dense.
    o_ref[...] = (
        jnp.dot(w_ref[...], p_ref[...], preferred_element_type=jnp.float32)
        + b_ref[...]
    )


def history_transform(history, weight, bias, *, tile_p=2048):
    """Conv2d(in=1, out=64, k=3, stride=2, pad=1, bias=True) on (1,1,H,W).

    im2col builds a lane-dense (9, Ho*Wo) patch matrix; a tiled Pallas MXU
    kernel computes (64,9) @ (9,TILE_P) + bias per pixel tile. Returns
    (1, 64, Ho, Wo) in NCHW (no transpose needed).
    """
    _, _, H, W = history.shape
    Ho = (H + 2 - 3) // 2 + 1
    Wo = (W + 2 - 3) // 2 + 1
    P = Ho * Wo

    xp = jnp.pad(history[0, 0], ((1, 1), (1, 1)))
    taps = []
    for dy in range(3):
        for dx in range(3):
            taps.append(
                lax.slice(
                    xp,
                    (dy, dx),
                    (dy + 2 * (Ho - 1) + 1, dx + 2 * (Wo - 1) + 1),
                    (2, 2),
                ))
    # (9, Ho*Wo): tap index dy*3+dx matches weight.reshape(64, 9) ordering.
    patches = jnp.stack(taps, axis=0).reshape(9, P).astype(jnp.float32)

    w_mat = weight.reshape(64, 9).astype(jnp.float32)
    b_col = bias.reshape(64, 1).astype(jnp.float32)

    tile = min(int(tile_p), _round_up(P, 128))
    n_p = pl.cdiv(P, tile)

    out = pl.pallas_call(
        _conv_matmul_kernel,
        out_shape=jax.ShapeDtypeStruct((64, P), jnp.float32),
        grid=(n_p,),
        in_specs=[
            pl.BlockSpec((64, 9), lambda i: (0, 0)),     # weight, resident
            pl.BlockSpec((64, 1), lambda i: (0, 0)),     # bias, resident
            pl.BlockSpec((9, tile), lambda i: (0, i)),   # patch tile (lanes=P)
        ],
        out_specs=pl.BlockSpec((64, tile), lambda i: (0, i)),
        compiler_params=pltpu.CompilerParams(
            dimension_semantics=("parallel",),
            vmem_limit_bytes=_VMEM_LIMIT_BYTES,
        ),
    )(w_mat, b_col, patches)

    return out.reshape(64, Ho, Wo)[None]  # (1, 64, Ho, Wo), already NCHW


# ----------------------------- forward stub ---------------------------------

def generalized_rcnn_forward_stub(images, history, pixel_mean, pixel_std,
                                  hist_w, hist_b, size_divisibility=32):
    """Self-contained parts of GeneralizedRCNN.forward (iterdet-on path):
    preprocess_image (normalize + pad) and history_transform."""
    imgs = normalize_and_pad(images, pixel_mean, pixel_std, size_divisibility)
    # ImageList.from_tensors on the raw history map is a pure zero-pad; reuse
    # the fused kernel with mean=0 / std=1.
    hist_padded = normalize_and_pad(
        history, jnp.zeros((1,), jnp.float32), jnp.ones((1,), jnp.float32),
        size_divisibility)
    hist_feat = history_transform(hist_padded, hist_w, hist_b)
    # TODO(synk): features = backbone(imgs, hist_feat); proposal_generator;
    # roi_heads; detector_postprocess — registry-built, not translatable here.
    return imgs, hist_feat


# -------------------------------- Main ---------------------------------------

if __name__ == "__main__":
    key = jax.random.PRNGKey(0)
    k_img, k_hist, k_w, k_b = jax.random.split(key, 4)

    B, C, H, W = 2, 3, 16, 16
    size_div = 32
    images = jax.random.uniform(k_img, (B, C, H, W), jnp.float32) * 255.0

    # Deterministic "cfg" params (detectron2-style pixel stats).
    pixel_mean = jnp.array([103.530, 116.280, 123.675], jnp.float32)
    pixel_std = jnp.array([57.375, 57.120, 58.395], jnp.float32)

    # history_transform params: Conv2d(1, 64, 3, stride=2, padding=1, bias=True)
    hist_w = jax.random.normal(k_w, (64, 1, 3, 3), jnp.float32) * 0.1
    hist_b = jax.random.normal(k_b, (64,), jnp.float32) * 0.1

    # History map (e.g. instances.history) at the (to-be-padded) image size.
    history = jax.random.uniform(k_hist, (1, 1, H, W), jnp.float32)

    fwd = jax.jit(generalized_rcnn_forward_stub,
                  static_argnames=("size_divisibility",))
    imgs_out, hist_feat = fwd(images, history, pixel_mean, pixel_std,
                              hist_w, hist_b, size_divisibility=size_div)
    jax.block_until_ready((imgs_out, hist_feat))

    # ----- reference checks (pure JAX / XLA) -----
    Hp = _round_up(H, size_div)
    Wp = _round_up(W, size_div)

    ref_norm = (images - pixel_mean.reshape(1, C, 1, 1)) / pixel_std.reshape(1, C, 1, 1)
    ref_imgs = jnp.pad(ref_norm, ((0, 0), (0, 0), (0, Hp - H), (0, Wp - W)))
    np.testing.assert_allclose(np.asarray(imgs_out), np.asarray(ref_imgs),
                               rtol=1e-5, atol=1e-5)

    hist_padded_ref = jnp.pad(history, ((0, 0), (0, 0), (0, Hp - H), (0, Wp - W)))
    ref_conv = lax.conv_general_dilated(
        hist_padded_ref, hist_w, window_strides=(2, 2),
        padding=((1, 1), (1, 1)),
        dimension_numbers=("NCHW", "OIHW", "NCHW"),
    ) + hist_b.reshape(1, 64, 1, 1)
    np.testing.assert_allclose(np.asarray(hist_feat), np.asarray(ref_conv),
                               rtol=1e-4, atol=1e-4)

    print("KERNEL_OK")
</pallas_src>

<mosaic_0001>
module attributes {stable_mosaic.version = 11 : i64} {
  func.func @_norm_pad_kernel(%arg0: i32, %arg1: i32, %arg2: memref<1x16x16xf32, #tpu.memory_space<vmem>>, %arg3: memref<1x1x1xf32, #tpu.memory_space<vmem>>, %arg4: memref<1x1x1xf32, #tpu.memory_space<vmem>>, %arg5: memref<1x16x32xf32, #tpu.memory_space<vmem>>) attributes {dimension_semantics = [#tpu.dimension_semantics<parallel>, #tpu.dimension_semantics<parallel>], iteration_bounds = array<i64: 1, 2>, scalar_prefetch = 0 : i64, scratch_operands = 0 : i64, tpu.core_type = #tpu.core_type<tc>, window_params = [{transform_indices = @transform_0, window_bounds = array<i64: 1, 16, 16>}, {transform_indices = @transform_1, window_bounds = array<i64: 1, 1, 1>}, {transform_indices = @transform_2, window_bounds = array<i64: 1, 1, 1>}, {transform_indices = @transform_3, window_bounds = array<i64: 1, 16, 32>}]} {
    %c0 = arith.constant 0 : index
    %c0_0 = arith.constant 0 : index
    %c0_1 = arith.constant 0 : index
    %0 = vector.load %arg3[%c0, %c0_0, %c0_1] : memref<1x1x1xf32, #tpu.memory_space<vmem>>, vector<1x1x1xf32>
    %1 = vector.extract %0[0, 0, 0] : f32 from vector<1x1x1xf32>
    %c0_2 = arith.constant 0 : index
    %c0_3 = arith.constant 0 : index
    %c0_4 = arith.constant 0 : index
    %2 = vector.load %arg4[%c0_2, %c0_3, %c0_4] : memref<1x1x1xf32, #tpu.memory_space<vmem>>, vector<1x1x1xf32>
    %3 = vector.extract %2[0, 0, 0] : f32 from vector<1x1x1xf32>
    %c16_i32 = arith.constant 16 : i32
    %4 = arith.muli %arg1, %c16_i32 : i32
    %5 = tpu.iota {dimensions = array<i32: 0>} : vector<16x16xi32>
    %6 = vector.broadcast %4 : i32 to vector<16x16xi32>
    %7 = arith.addi %6, %5 : vector<16x16xi32>
    %c16_i32_5 = arith.constant 16 : i32
    %8 = vector.broadcast %c16_i32_5 : i32 to vector<16x16xi32>
    %9 = arith.cmpi slt, %7, %8 : vector<16x16xi32>
    %c0_6 = arith.constant 0 : index
    %c0_7 = arith.constant 0 : index
    %c0_8 = arith.constant 0 : index
    %10 = vector.load %arg2[%c0_6, %c0_7, %c0_8] : memref<1x16x16xf32, #tpu.memory_space<vmem>>, vector<1x16x16xf32>
    %11 = vector.shape_cast %10 : vector<1x16x16xf32> to vector<16x16xf32>
    %12 = vector.broadcast %1 : f32 to vector<16x16xf32>
    %13 = arith.subf %11, %12 : vector<16x16xf32>
    %14 = vector.broadcast %3 : f32 to vector<16x16xf32>
    %15 = arith.mulf %13, %14 : vector<16x16xf32>
    %cst = arith.constant 0.000000e+00 : f32
    %16 = vector.broadcast %cst : f32 to vector<16x16xf32>
    %17 = arith.select %9, %15, %16 : vector<16x16xi1>, vector<16x16xf32>
    %cst_9 = arith.constant 0.000000e+00 : f32
    %18 = vector.broadcast %cst_9 : f32 to vector<1x16x32xf32>
    %c0_10 = arith.constant 0 : index
    %c0_11 = arith.constant 0 : index
    %c0_12 = arith.constant 0 : index
    %19 = vector.load %arg5[%c0_10, %c0_11, %c0_12] : memref<1x16x32xf32, #tpu.memory_space<vmem>>, vector<1x16x32xf32>
    tpu.vector_store %arg5[%c0_10, %c0_11, %c0_12], %18 {strides = array<i32>} : memref<1x16x32xf32, #tpu.memory_space<vmem>>, vector<1x16x32xf32>,
    %c0_13 = arith.constant 0 : index
    %c0_14 = arith.constant 0 : index
    %c0_15 = arith.constant 0 : index
    %20 = vector.load %arg5[%c0_13, %c0_14, %c0_15] : memref<1x16x32xf32, #tpu.memory_space<vmem>>, vector<1x16x16xf32>
    %21 = vector.shape_cast %20 : vector<1x16x16xf32> to vector<16x16xf32>
    %22 = vector.shape_cast %17 : vector<16x16xf32> to vector<1x16x16xf32>
    tpu.vector_store %arg5[%c0_13, %c0_14, %c0_15], %22 {strides = array<i32>} : memref<1x16x32xf32, #tpu.memory_space<vmem>>, vector<1x16x16xf32>,
    return
  }
  func.func @transform_0(%arg0: i32, %arg1: i32) -> (i32, i32, i32) {
    %c0_i32 = arith.constant 0 : i32
    %0 = arith.minsi %arg1, %c0_i32 : i32
    %c0_i32_0 = arith.constant 0 : i32
    %c0_i32_1 = arith.constant 0 : i32
    return %arg0, %0, %c0_i32_0 : i32, i32, i32
  }
  func.func @transform_1(%arg0: i32, %arg1: i32) -> (i32, i32, i32) {
    %c0_i32 = arith.constant 0 : i32
    %c0_i32_0 = arith.constant 0 : i32
    %c0_i32_1 = arith.constant 0 : i32
    return %arg0, %c0_i32, %c0_i32_0 : i32, i32, i32
  }
  func.func @transform_2(%arg0: i32, %arg1: i32) -> (i32, i32, i32) {
    %c0_i32 = arith.constant 0 : i32
    %c0_i32_0 = arith.constant 0 : i32
    %c0_i32_1 = arith.constant 0 : i32
    return %arg0, %c0_i32, %c0_i32_0 : i32, i32, i32
  }
  func.func @transform_3(%arg0: i32, %arg1: i32) -> (i32, i32, i32) {
    %c0_i32 = arith.constant 0 : i32
    %c0_i32_0 = arith.constant 0 : i32
    return %arg0, %arg1, %c0_i32 : i32, i32, i32
  }
}

module attributes {stable_mosaic.version = 11 : i64} {
  func.func @_conv_matmul_kernel(%arg0: i32, %arg1: memref<64x9xf32, #tpu.memory_space<vmem>>, %arg2: memref<64x1xf32, #tpu.memory_space<vmem>>, %arg3: memref<9x256xf32, #tpu.memory_space<vmem>>, %arg4: memref<64x256xf32, #tpu.memory_space<vmem>>) attributes {dimension_semantics = [#tpu.dimension_semantics<parallel>], iteration_bounds = array<i64: 1>, scalar_prefetch = 0 : i64, scratch_operands = 0 : i64, tpu.core_type = #tpu.core_type<tc>, window_params = [{pipeline_mode = #tpu.pipeline_mode<synchronous>, transform_indices = @transform_0, window_bounds = array<i64: 64, 9>}, {pipeline_mode = #tpu.pipeline_mode<synchronous>, transform_indices = @transform_1, window_bounds = array<i64: 64, 1>}, {transform_indices = @transform_2, window_bounds = array<i64: 9, 256>}, {transform_indices = @transform_3, window_bounds = array<i64: 64, 256>}]} {
    %c0 = arith.constant 0 : index
    %c0_0 = arith.constant 0 : index
    %0 = vector.load %arg1[%c0, %c0_0] : memref<64x9xf32, #tpu.memory_space<vmem>>, vector<64x9xf32>
    %c0_1 = arith.constant 0 : index
    %c0_2 = arith.constant 0 : index
    %1 = vector.load %arg3[%c0_1, %c0_2] : memref<9x256xf32, #tpu.memory_space<vmem>>, vector<9x256xf32>
    %cst = arith.constant dense<0.000000e+00> : vector<64x256xf32>
    %2 = tpu.matmul %0, %1, %cst {dimension_numbers = #tpu.dot_dimension_numbers<[1], [0], [0], [1], [0, 0, 1, 1], [], []>} : vector<64x9xf32>, vector<9x256xf32>, vector<64x256xf32> -> vector<64x256xf32>
    %c0_3 = arith.constant 0 : index
    %c0_4 = arith.constant 0 : index
    %3 = vector.load %arg2[%c0_3, %c0_4] : memref<64x1xf32, #tpu.memory_space<vmem>>, vector<64x1xf32>
    %4 = vector.broadcast %3 : vector<64x1xf32> to vector<64x256xf32>
    %5 = arith.addf %2, %4 : vector<64x256xf32>
    %c0_5 = arith.constant 0 : index
    %c0_6 = arith.constant 0 : index
    %6 = vector.load %arg4[%c0_5, %c0_6] : memref<64x256xf32, #tpu.memory_space<vmem>>, vector<64x256xf32>
    tpu.vector_store %arg4[%c0_5, %c0_6], %5 {strides = array<i32>} : memref<64x256xf32, #tpu.memory_space<vmem>>, vector<64x256xf32>,
    return
  }
  func.func @transform_0(%arg0: i32) -> (i32, i32) {
    %c0_i32 = arith.constant 0 : i32
    %c0_i32_0 = arith.constant 0 : i32
    %c0_i32_1 = arith.constant 0 : i32
    return %c0_i32, %c0_i32_0 : i32, i32
  }
  func.func @transform_1(%arg0: i32) -> (i32, i32) {
    %c0_i32 = arith.constant 0 : i32
    %c0_i32_0 = arith.constant 0 : i32
    %c0_i32_1 = arith.constant 0 : i32
    return %c0_i32, %c0_i32_0 : i32, i32
  }
  func.func @transform_2(%arg0: i32) -> (i32, i32) {
    %c0_i32 = arith.constant 0 : i32
    %c0_i32_0 = arith.constant 0 : i32
    return %c0_i32, %arg0 : i32, i32
  }
  func.func @transform_3(%arg0: i32) -> (i32, i32) {
    %c0_i32 = arith.constant 0 : i32
    %c0_i32_0 = arith.constant 0 : i32
    return %c0_i32, %arg0 : i32, i32
  }
}

module attributes {stable_mosaic.version = 11 : i64} {
  func.func @_norm_pad_kernel(%arg0: i32, %arg1: i32, %arg2: memref<1x16x16xf32, #tpu.memory_space<vmem>>, %arg3: memref<1x1x1xf32, #tpu.memory_space<vmem>>, %arg4: memref<1x1x1xf32, #tpu.memory_space<vmem>>, %arg5: memref<1x16x32xf32, #tpu.memory_space<vmem>>) attributes {dimension_semantics = [#tpu.dimension_semantics<parallel>, #tpu.dimension_semantics<parallel>], iteration_bounds = array<i64: 6, 2>, scalar_prefetch = 0 : i64, scratch_operands = 0 : i64, tpu.core_type = #tpu.core_type<tc>, window_params = [{transform_indices = @transform_0, window_bounds = array<i64: 1, 16, 16>}, {transform_indices = @transform_1, window_bounds = array<i64: 1, 1, 1>}, {transform_indices = @transform_2, window_bounds = array<i64: 1, 1, 1>}, {transform_indices = @transform_3, window_bounds = array<i64: 1, 16, 32>}]} {
    %c0 = arith.constant 0 : index
    %c0_0 = arith.constant 0 : index
    %c0_1 = arith.constant 0 : index
    %0 = vector.load %arg3[%c0, %c0_0, %c0_1] : memref<1x1x1xf32, #tpu.memory_space<vmem>>, vector<1x1x1xf32>
    %1 = vector.extract %0[0, 0, 0] : f32 from vector<1x1x1xf32>
    %c0_2 = arith.constant 0 : index
    %c0_3 = arith.constant 0 : index
    %c0_4 = arith.constant 0 : index
    %2 = vector.load %arg4[%c0_2, %c0_3, %c0_4] : memref<1x1x1xf32, #tpu.memory_space<vmem>>, vector<1x1x1xf32>
    %3 = vector.extract %2[0, 0, 0] : f32 from vector<1x1x1xf32>
    %c16_i32 = arith.constant 16 : i32
    %4 = arith.muli %arg1, %c16_i32 : i32
    %5 = tpu.iota {dimensions = array<i32: 0>} : vector<16x16xi32>
    %6 = vector.broadcast %4 : i32 to vector<16x16xi32>
    %7 = arith.addi %6, %5 : vector<16x16xi32>
    %c16_i32_5 = arith.constant 16 : i32
    %8 = vector.broadcast %c16_i32_5 : i32 to vector<16x16xi32>
    %9 = arith.cmpi slt, %7, %8 : vector<16x16xi32>
    %c0_6 = arith.constant 0 : index
    %c0_7 = arith.constant 0 : index
    %c0_8 = arith.constant 0 : index
    %10 = vector.load %arg2[%c0_6, %c0_7, %c0_8] : memref<1x16x16xf32, #tpu.memory_space<vmem>>, vector<1x16x16xf32>
    %11 = vector.shape_cast %10 : vector<1x16x16xf32> to vector<16x16xf32>
    %12 = vector.broadcast %1 : f32 to vector<16x16xf32>
    %13 = arith.subf %11, %12 : vector<16x16xf32>
    %14 = vector.broadcast %3 : f32 to vector<16x16xf32>
    %15 = arith.mulf %13, %14 : vector<16x16xf32>
    %cst = arith.constant 0.000000e+00 : f32
    %16 = vector.broadcast %cst : f32 to vector<16x16xf32>
    %17 = arith.select %9, %15, %16 : vector<16x16xi1>, vector<16x16xf32>
    %cst_9 = arith.constant 0.000000e+00 : f32
    %18 = vector.broadcast %cst_9 : f32 to vector<1x16x32xf32>
    %c0_10 = arith.constant 0 : index
    %c0_11 = arith.constant 0 : index
    %c0_12 = arith.constant 0 : index
    %19 = vector.load %arg5[%c0_10, %c0_11, %c0_12] : memref<1x16x32xf32, #tpu.memory_space<vmem>>, vector<1x16x32xf32>
    tpu.vector_store %arg5[%c0_10, %c0_11, %c0_12], %18 {strides = array<i32>} : memref<1x16x32xf32, #tpu.memory_space<vmem>>, vector<1x16x32xf32>,
    %c0_13 = arith.constant 0 : index
    %c0_14 = arith.constant 0 : index
    %c0_15 = arith.constant 0 : index
    %20 = vector.load %arg5[%c0_13, %c0_14, %c0_15] : memref<1x16x32xf32, #tpu.memory_space<vmem>>, vector<1x16x16xf32>
    %21 = vector.shape_cast %20 : vector<1x16x16xf32> to vector<16x16xf32>
    %22 = vector.shape_cast %17 : vector<16x16xf32> to vector<1x16x16xf32>
    tpu.vector_store %arg5[%c0_13, %c0_14, %c0_15], %22 {strides = array<i32>} : memref<1x16x32xf32, #tpu.memory_space<vmem>>, vector<1x16x16xf32>,
    return
  }
  func.func @transform_0(%arg0: i32, %arg1: i32) -> (i32, i32, i32) {
    %c0_i32 = arith.constant 0 : i32
    %0 = arith.minsi %arg1, %c0_i32 : i32
    %c0_i32_0 = arith.constant 0 : i32
    %c0_i32_1 = arith.constant 0 : i32
    return %arg0, %0, %c0_i32_0 : i32, i32, i32
  }
  func.func @transform_1(%arg0: i32, %arg1: i32) -> (i32, i32, i32) {
    %c0_i32 = arith.constant 0 : i32
    %c0_i32_0 = arith.constant 0 : i32
    %c0_i32_1 = arith.constant 0 : i32
    return %arg0, %c0_i32, %c0_i32_0 : i32, i32, i32
  }
  func.func @transform_2(%arg0: i32, %arg1: i32) -> (i32, i32, i32) {
    %c0_i32 = arith.constant 0 : i32
    %c0_i32_0 = arith.constant 0 : i32
    %c0_i32_1 = arith.constant 0 : i32
    return %arg0, %c0_i32, %c0_i32_0 : i32, i32, i32
  }
  func.func @transform_3(%arg0: i32, %arg1: i32) -> (i32, i32, i32) {
    %c0_i32 = arith.constant 0 : i32
    %c0_i32_0 = arith.constant 0 : i32
    return %arg0, %arg1, %c0_i32 : i32, i32, i32
  }
}

</mosaic_0001>

<bundles_post_ra>
// kernel: tile.18
= control target key start
LH: loop header
LB: loop body
LE: loop exit
PB: predicated region body
PF: predicated region fallthrough
CT: control target
= control target key end

     0   :  { %s22_s0 = inlined_call_operand.vmem [shape: f32[3], index: 0, kind: input, shape index: {}]   ;;  %s23_s1 = inlined_call_operand.vmem [shape: f32[2,3], index: 1, kind: output, shape index: {}]  }
   0x1   :  { %v4_v0 = vld [vmem:[%s22_s0] ss:$0 sm:$0xff] }
   0x2   :  { %5 = vst [vmem:[%s23_s1] sm:$0x3] %v4_v0 }

// kernel: tile.0
= control target key start
LH: loop header
LB: loop body
LE: loop exit
PB: predicated region body
PF: predicated region fallthrough
CT: control target
= control target key end

     0   :  { %s68_s8 = smov 127   ;;  %s18_s9 = smov 3  ;;  %vm7_vm0 = vcmask 7168   ;;  %s101_s0 = inlined_call_operand.vmem [shape: f32[2,3], index: 0, kind: input, shape index: {}]   ;;  %s102_s1 = inlined_call_operand.vmem [shape: f32[6,1,1], index: 1, kind: output, shape index: {}]  }
   0x1   :  { %v4_v0 = vld [vmem:[%s101_s0] sm:$0x3]  ;;  %s10_s0 = smov 3  ;;  %s69_s10 = smov 126  }
   0x2   :  { %5 = vst [vmem:[#allocation1] sm:$0x3] %v4_v0 }
   0x9   :  { %v11_v1 = vld [vmem:[#allocation1 + $0x1] ss:$-1 sm:%s10_s0]  }
   0xa   :  { %12 = vrot.lane.b32.xlu0 %v11_v1, %s68_s8  ;;  %v19_v2 = vld [vmem:[#allocation1 + $0x1] ss:$-1 sm:%s18_s9]  }
   0xb   :  { %v6_v3 = vld [vmem:[#allocation1] sm:$0x3]  }
   0xc   :  { %8 = vst.msk [vmem:[#allocation0] ss:$24 sm:$0x3] %vm7_vm0, %v6_v3  }
  0x12   :  { %20 = vrot.lane.b32.xlu0 %v19_v2, %s69_s10 }
  0x13   :  { %v27_v4 = vld [vmem:[#allocation0] sm:$0x1]  ;;  %v44_v5 = vld [vmem:[#allocation0 + $0x18] sm:$0x1] }
  0x14   :  { %30 = vst [vmem:[%s102_s1] sm:$0x1] %v27_v4 }
  0x15   :  { %63 = vst [vmem:[%s102_s1 + $0x3] sm:$0x1] %v44_v5 }
  0x7c   :  { %v13_v6 = vpop.permute.xlu0 %12  }
  0x7d   :  { %16 = vst.msk [vmem:[#allocation0 + $0x20] ss:$-24 sm:$0x3] %vm7_vm0, %v13_v6  }
  0x84   :  { %v32_v7 = vld [vmem:[#allocation0 + $0x8] sm:$0x1]  ;;  %v50_v8 = vld [vmem:[#allocation0 + $0x20] sm:$0x1]  ;;  %v21_v9 = vpop.permute.xlu0 %20  }
  0x85   :  { %61 = vst [vmem:[%s102_s1 + $0x1] sm:$0x1] %v32_v7 }
  0x86   :  { %64 = vst [vmem:[%s102_s1 + $0x4] sm:$0x1] %v50_v8 }
  0x87   :  { %24 = vst.msk [vmem:[#allocation0 + $0x28] ss:$-24 sm:$0x3] %vm7_vm0, %v21_v9  }
  0x8e   :  { %v38_v10 = vld [vmem:[#allocation0 + $0x10] sm:$0x1]  ;;  %v56_v11 = vld [vmem:[#allocation0 + $0x28] sm:$0x1] }
  0x8f   :  { %62 = vst [vmem:[%s102_s1 + $0x2] sm:$0x1] %v38_v10 }
  0x90   :  { %65 = vst [vmem:[%s102_s1 + $0x5] sm:$0x1] %v56_v11 }

// kernel: generalized_rcnn_forward_stub.4
= control target key start
LH: loop header
LB: loop body
LE: loop exit
PB: predicated region body
PF: predicated region fallthrough
CT: control target
= control target key end

     0   :  { %s490_s16 = smov 0   ;;  %s492_s17 = smov 0   ;;  %s535_s0 = inlined_call_operand.vmem [shape: f32[1,16,16], index: 0, kind: input, shape index: {}]   ;;  %s536_s1 = inlined_call_operand.<no memory space> [shape: f32[1,1,1], index: 1, kind: input, shape index: {}]   ;;  %s537_s3 = inlined_call_operand.vmem [shape: f32[1,32,32], index: 3, kind: output, shape index: {}]   ;;  %s538_s2 = inlined_call_operand.<no memory space> [shape: f32[1,1,1], index: 2, kind: input, shape index: {}]  }
   0x1   :  { %v8_v0 = vstv %s536_s1  ;;  %v10_v1 = vstv %s538_s2  ;;  %s494_s18 = smov 0  }
   0x2   :  { %9 = vst [vmem:[#allocation2] sm:$0x1] %v8_v0 }
   0x3   :  { %11 = vst [vmem:[#allocation3] sm:$0x1] %v10_v1 }
   0x4 LB: > { %s26_s1 = sadd.s32 1, %s457_s17  ;;  %p402_p0 = scmp.ge.s32.totalorder %s461_s18, 1  ;;  %s461_s18 = sphi %s494_s18, %s17_s18   ;;  %s457_s17 = sphi %s492_s17, %s540_s17   ;;  %s453_s16 = sphi %s490_s16, %s539_s16  }
   0x5   : > { %p27_p1 = scmp.ge.s32.totalorder %s26_s1, 2  ;;  %p186_p2 = scmp.lt.s32.totalorder %s461_s18, 3 }
   0x7   : > { %s542_s1 = smov (%p27_p1, %s26_s1), 0  ;;  %p187_p3 = pnand %p402_p0, %p186_p2 }
   0x8   : > { %s405_s2 = sshll.u32 (!%p187_p3), %s453_s16, 1  ;;  %p226_p5 = scmp.lt.s32.totalorder (!%p187_p3), %s453_s16, 0 }
   0x9   : > { %190 = sbr.rel (%p187_p3) target bundleno = 73 (0x49), region = 32  ;;  %p249_p4 = scmp.lt.s32.totalorder (!%p187_p3), %s405_s2, 3 }
   0xa   : > { %s407_s26 = sshll.u32 (!%p187_p3), %s453_s16, 4 }
   0xe   : > { %v256_v2 = vld [vmem:[#allocation2] sm:$0x1]  ;;  %v258_v3 = vld [vmem:[#allocation3] sm:$0x1]  ;;  %s544_s2 = smov (!%p249_p4, %s405_s2), 3  ;;  %vm279_vm0 = vcmask 261120   ;;  %v261_v5 = vlaneseq  ;;  %v264_v8 = vstv %s407_s26 }
   0xf   : > { %410 = vpush %v256_v2  ;;  %s406_s19 = sshll.u32 %s544_s2, 3  ;;  %v463_v4 = vmov 0.0   ;;  %vm282_vm3 = vcmask 130048  }
  0x10   : > { %412 = vpush %v258_v3  ;;  %s514_s22 = scalar_lea.vmem %s537_s3, %s406_s19  ;;  %v262_v6 = vshrl.u32 %v261_v5, 7 }
  0x11   : > { %280 = vst.msk [vmem:[%s514_s22] sm:$0xff] %vm279_vm0, %v463_v4  ;;  %s227_s23 = scalar_select %p226_p5, %s453_s16, 0 }
  0x12   : > { %281 = vst.msk [vmem:[%s514_s22 + $0x8] sm:$0xff] %vm279_vm0, %v463_v4  ;;  %v263_v7 = vadd.s32 8, %v262_v6  ;;  %v265_v11 = vadd.s32 %v264_v8, %v262_v6 }
  0x13   : > { %s403_s24 = sshll.u32 %s227_s23, 1 }
  0x14   : > { %p231_p6 = scmp.lt.s32.totalorder %s403_s24, 1  ;;  %v266_v12 = vadd.s32 %v264_v8, %v263_v7  ;;  %vm267_vm1 = vcmp.lt.s32.totalorder %v265_v11, 16 }
  0x16   : > { %s546_s24 = smov (!%p231_p6, %s403_s24), 1  ;;  %vm268_vm2 = vcmp.lt.s32.totalorder %v266_v12, 16 }
  0x17   : > { %s404_s25 = sshll.u32 %s546_s24, 3 }
  0x18   : > { %s236_s29 = scalar_lea.vmem %s535_s0, %s404_s25 }
  0x19   : > { %v269_v9 = vld [vmem:[%s236_s29] sm:$0xff]  ;;  %v270_v10 = vld [vmem:[%s236_s29 + $0x8] sm:$0xff] }
  0x40   : > { %s411_s30 = spop %410 }
  0x41   : > { %v271_v13 = vstv %s411_s30  ;;  %s413_s4 = spop %412 }
  0x42   : > { %v272_v14 = vsub.f32 %v269_v9, %v271_v13  ;;  %v273_v15 = vsub.f32 %v270_v10, %v271_v13  ;;  %v274_v16 = vstv %s413_s4 }
  0x44   : > { %v275_v17 = vmul.f32 %v274_v16, %v272_v14  ;;  %v276_v18 = vmul.f32 %v274_v16, %v273_v15 }
  0x46   : > { %v277_v19 = vsel %vm267_vm1, %v275_v17, 0.0  ;;  %v278_v20 = vsel %vm268_vm2, %v276_v18, 0.0 }
  0x47   : > { %283 = vst.msk [vmem:[%s514_s22] sm:$0xff] %vm282_vm3, %v277_v19 }
  0x48   : > { %284 = vst.msk [vmem:[%s514_s22 + $0x8] sm:$0xff] %vm282_vm3, %v278_v20 }
  0x49 PF: > { %s17_s18 = sadd.s32 1, %s461_s18   ;;  %s539_s16 = smov %s457_s17 }
  0x4a   : > { %p14_p7 = scmp.ge.s32.totalorder %s17_s18, 4   ;;  %s540_s17 = smov %s542_s1 }
  0x4c   :  { %16 = sbr.rel (!%p14_p7) target bundleno = 4 (0x4), region = 68 }

// kernel: generalized_rcnn_forward_stub.3
= control target key start
LH: loop header
LB: loop body
LE: loop exit
PB: predicated region body
PF: predicated region fallthrough
CT: control target
= control target key end

     0   :  { %s742_s0 = inlined_call_operand.vmem [shape: f32[6,16,16], index: 0, kind: input, shape index: {}]   ;;  %s743_s1 = inlined_call_operand.vmem [shape: f32[6,1,1], index: 1, kind: input, shape index: {}]   ;;  %s744_s2 = inlined_call_operand.vmem [shape: f32[6,1,1], index: 2, kind: input, shape index: {}]   ;;  %s745_s3 = inlined_call_operand.hbm [shape: f32[6,32,32], index: 3, kind: output, shape index: {}]  }
   0x1   :  { %747 = sst [smem:[#allocation5_spill]] %s743_s1 }
   0x2   :  { %8 = vsyncpa [#allocation3], 0 }
   0x3   :  { %10 = vsyncpa [#allocation3 + $0x1], 0  ;;  %s602_s12 = smov 0   ;;  %s604_s13 = smov 0  }
   0x4   :  { %s606_s14 = smov 0   ;;  %s608_s15 = smov 0  }
   0x5   :  { %s610_s16 = smov 0   ;;  %s612_s17 = smov 0  }
   0x6   :  { %s614_s18 = smov 0   ;;  %s616_s19 = smov 0  }
   0x7 LB: > { %s389_s20 = sadd.s32 4294967295, %s577_s19   ;;  %s390_s21 = sadd.s32 4294967294, %s577_s19   ;;  %s577_s19 = sphi %s616_s19, %s16_s19   ;;  %s573_s18 = sphi %s614_s18, %s758_s18   ;;  %s569_s17 = sphi %s612_s17, %s757_s17   ;;  %s565_s16 = sphi %s610_s16, %s756_s16   ;;  %s561_s15 = sphi %s608_s15, %s755_s15   ;;  %s557_s14 = sphi %s606_s14, %s754_s14   ;;  %s553_s13 = sphi %s604_s13, %s753_s13   ;;  %s549_s12 = sphi %s602_s12, %s752_s12  }
   0x8   : > { %s25_s22 = sadd.s32 1, %s569_s17  ;;  %s28_s23 = sadd.s32 1, %s573_s18 }
   0x9   : > { %p26_p0 = scmp.ge.s32.totalorder %s25_s22, 2  ;;  %p131_p1 = scmp.ne.s32.totalorder %s557_s14, %s553_s13 }
   0xa   : > { %p132_p2 = scmp.eq.s32.totalorder %s389_s20, 11  ;;  %p137_p5 = scmp.ne.s32.totalorder %s553_s13, %s549_s12 }
   0xb   : > { %s760_s22 = smov (%p26_p0, %s25_s22), 0  ;;  %s762_s23 = smov (!%p26_p0, %s28_s23), %s573_s18 }
   0xc   : > { %s117_s24 = ssub.s32 %s569_s17, %s760_s22  ;;  %p653_p3 = por %p132_p2, %p131_p1 }
   0xd   : > { %p30_p4 = scmp.ge.s32.totalorder %s762_s23, 6  ;;  %p138_p6 = scmp.eq.s32.totalorder %s390_s21, 11 }
   0xe   : > { %p393_p7 = scmp.ge.s32.totalorder %s577_s19, 1  ;;  %p185_p9 = scmp.lt.s32.totalorder %s577_s19, 13 }
   0xf   : > { %s764_s23 = smov (%p30_p4, %s762_s23), 0  ;;  %p662_p8 = por %p138_p6, %p137_p5 }
  0x10   : > { %s116_s27 = ssub.s32 %s573_s18, %s764_s23  ;;  %s121_s28 = sadd.s32 1, %s557_s14 }
  0x11   : > { %s118_s29 = sor.u32 %s117_s24, %s116_s27  ;;  %p186_p10 = pnand %p393_p7, %p185_p9 }
  0x12   : > { %p119_p11 = scmp.eq.s32.totalorder %s118_s29, 0  ;;  %p224_p12 = scmp.lt.s32.totalorder (!%p186_p10), %s565_s16, 5 }
  0x13   : > { %189 = sbr.rel (%p186_p10) target bundleno = 89 (0x59), region = 32  ;;  %s750_s1 = sld [smem:[#allocation5_spill]] (!%p186_p10) }
  0x14   : > { %s671_s30 = scalar_select %p119_p11, %s557_s14, %s121_s28  }
  0x15   : > { %s746_s11 = sand.u32 (!%p186_p10), 1, %s553_s13   ;;  %p221_p13 = scmp.lt.s32.totalorder (!%p186_p10), %s561_s15, 0 }
  0x16   : > { %s394_s20 = sshll.u32 (!%p186_p10), %s746_s11, 4  ;;  %s400_s29 = sshll.u32 (!%p186_p10), %s561_s15, 1 }
  0x17   : > { %s685_s21 = scalar_lea.vmem (!%p186_p10), [#allocation2], %s394_s20  ;;  %s401_s6 = sshll.u32 (!%p186_p10), %s565_s16, 2 }
  0x18   : > { %s225_s4 = scalar_select %p224_p12, %s565_s16, 5  ;;  %vm265_vm0 = vcmask 261120   ;;  %v579_v2 = vmov 0.0   ;;  %v247_v3 = vlaneseq  ;;  %vm268_vm3 = vcmask 130048  }
  0x19   : > { %266 = vst.msk [vmem:[%s685_s21] sm:$0xff] %vm265_vm0, %v579_v2  ;;  %s222_s24 = scalar_select %p221_p13, %s561_s15, 0 }
  0x1a   : > { %s237_s7 = scalar_lea.vmem %s750_s1, %s225_s4  ;;  %s240_s10 = scalar_lea.vmem %s744_s2, %s225_s4  ;;  %267 = vst.msk [vmem:[%s685_s21 + $0x8] sm:$0xff] %vm265_vm0, %v579_v2  ;;  %v248_v4 = vshrl.u32 %v247_v3, 7 }
  0x1b   : > { %v242_v0 = vld [vmem:[%s237_s7] sm:$0x1]  ;;  %s395_s27 = sshll.u32 %s222_s24, 1  ;;  %s396_s28 = sshll.u32 %s225_s4, 1 }
  0x1c   : > { %v244_v1 = vld [vmem:[%s240_s10] sm:$0x1]  ;;  %405 = vpush %v242_v0  ;;  %p226_p0 = scmp.lt.s32.totalorder %s395_s27, 1  ;;  %s398_s7 = sshll.u32 %s561_s15, 4  ;;  %v249_v5 = vadd.s32 8, %v248_v4 }
  0x1d   : > { %407 = vpush %v244_v1  ;;  %s283_s9 = sadd.s32 %s401_s6, %s400_s29  ;;  %v250_v6 = vstv %s398_s7 }
  0x1e   : > { %s766_s27 = smov (!%p226_p0, %s395_s27), 1  ;;  %s402_s1 = sshll.u32 %s283_s9, 3  ;;  %v251_v9 = vadd.s32 %v250_v6, %v248_v4  ;;  %v252_v10 = vadd.s32 %v250_v6, %v249_v5 }
  0x1f   : > { %s229_s5 = sadd.s32 %s396_s28, %s766_s27  ;;  %s285_s16 = scalar_lea.hbm %s745_s3, %s402_s1 }
  0x20   : > { %s397_s8 = sshll.u32 %s229_s5, 3  ;;  %s286_s28 = sshll.u32 %s685_s21, 4  ;;  %vm253_vm1 = vcmp.lt.s32.totalorder %v251_v9, 16  ;;  %vm254_vm2 = vcmp.lt.s32.totalorder %v252_v10, 16  ;;  %s287_s28 = int_to_ptr.vmem [resolvable:$true] %s286_s28 }
  0x21   : > { %s231_s11 = scalar_lea.vmem %s742_s0, %s397_s8  ;;  %s288_s29 = sshll.u32 %s285_s16, 4  ;;  %s289_s29 = int_to_ptr.hbm [resolvable:$true] %s288_s29 }
  0x22   : > { %v255_v7 = vld [vmem:[%s231_s11] sm:$0xff]  ;;  %v256_v8 = vld [vmem:[%s231_s11 + $0x8] sm:$0xff]  ;;  %s751_s1 = sand.u32 1, %s553_s13   ;;  %s497_s5 = sshra.s32 %s289_s29, 4  ;;  %s498_s5 = int_to_ptr.hbm [resolvable:$true] %s497_s5 }
  0x23   : > { %s272_s11 = scalar_lea.sflag [#allocation3], %s751_s1  ;;  %s499_s6 = scalar_lea.hbm %s498_s5, 16 }
  0x24   : > { %p500_p1 = scmp.ne.s32.totalorder %s498_s5, %s499_s6  ;;  %s503_s9 = scalar_lea.hbm %s745_s3, 192 }
  0x25   : > { %p504_p5 = scmp.lt.s32.totalorder %s498_s5, %s745_s3  ;;  %p505_p6 = scmp.lt.s32.totalorder %s503_s9, %s499_s6 }
  0x26   : > { %p501_p2 = pnand %p500_p1, %p653_p3 }
  0x27   : > { %p506_p7 = por %p505_p6, %p504_p5 }
  0x28   : > { %p502_p4 = pneg %p501_p2 }
  0x2a   : > { %p507_p9 = pnand %p506_p7, %p502_p4 }
  0x4d   : > { %s406_s27 = spop %405 }
  0x4e   : > { %v257_v11 = vstv %s406_s27  ;;  %s408_s15 = spop %407 }
  0x4f   : > { %v258_v12 = vsub.f32 %v255_v7, %v257_v11  ;;  %v259_v13 = vsub.f32 %v256_v8, %v257_v11  ;;  %v260_v14 = vstv %s408_s15 }
  0x51   : > { %v261_v15 = vmul.f32 %v260_v14, %v258_v12  ;;  %v262_v16 = vmul.f32 %v260_v14, %v259_v13 }
  0x53   : > { %v263_v17 = vsel %vm253_vm1, %v261_v15, 0.0  ;;  %v264_v18 = vsel %vm254_vm2, %v262_v16, 0.0 }
  0x54   : > { %269 = vst.msk [vmem:[%s685_s21] sm:$0xff] %vm268_vm3, %v263_v17 }
  0x55   : > { %270 = vst.msk [vmem:[%s685_s21 + $0x8] sm:$0xff] %vm268_vm3, %v264_v18 }
  0x56   : > { %510 = shalt.err (!%p507_p9)
}
  0x57   : > { %s580_s21 = smov 128   ;;  %s581_s4 = smov 8  }
  0x58   : > { %409 = dma.vmem_to_hbm [thread:$0]  (%p653_p3), %s287_s28, 256, %s289_s29, %s272_s11, %s580_s21, %s580_s21, %s581_s4  }
  0x59 PF: > { %p415_p10 = scmp.ge.s32.totalorder %s577_s19, 2  ;;  %s303_s24 = sand.u32 1, %s549_s12  }
  0x5a   : > { %s304_s16 = scalar_lea.sflag [#allocation3], %s303_s24 }
  0x5b   : > { %p412_p11 = pnand %p415_p10, %p662_p8 }
  0x5d   : > { %p413_p12 = pneg %p412_p11 }
  0x5f   : > { %544 = dma.done.wait (%p413_p12), %s304_s16, 256  }
  0x60   : > { %546 = vsyncadd (%p413_p12), %s304_s16, 4294967040  ;;  %s16_s19 = sadd.s32 1, %s577_s19   ;;  %s752_s12 = smov %s553_s13 }
  0x61   : > { %p13_p13 = scmp.ge.s32.totalorder %s16_s19, 14   ;;  %s753_s13 = smov %s557_s14 }
  0x62   : > { %s754_s14 = smov %s671_s30  ;;  %s755_s15 = smov %s569_s17 }
  0x63   : > { %s756_s16 = smov %s573_s18  ;;  %s757_s17 = smov %s760_s22 }
  0x64   : > { %s758_s18 = smov %s764_s23  ;;  %15 = sbr.rel (!%p13_p13) target bundleno = 7 (0x7), region = 73 }
  0x69   :  { %310 = vsyncpa [#allocation3], 1 }
  0x6a   :  { %312 = vsyncpa [#allocation3 + $0x1], 1 }

// kernel: generalized_rcnn_forward_stub.5
= control target key start
LH: loop header
LB: loop body
LE: loop exit
PB: predicated region body
PF: predicated region fallthrough
CT: control target
= control target key end

     0   :  { %vm99_vm0 = vcmask 1040384   ;;  %v234_v3 = vmov 0   ;;  %vm74_vm1 = vcmask 72704   ;;  %s379_s2 = inlined_call_operand.vmem [shape: f32[9,256], index: 2, kind: input, shape index: {}]   ;;  %s380_s0 = inlined_call_operand.vmem [shape: f32[64,9], index: 0, kind: input, shape index: {}]   ;;  %s381_s1 = inlined_call_operand.vmem [shape: f32[64,1], index: 1, kind: input, shape index: {}]   ;;  %s382_s3 = inlined_call_operand.vmem [shape: f32[64,256], index: 3, kind: output, shape index: {}]  }
   0x1   :  { %v24_v0 = vld [vmem:[%s379_s2 + $0x10] sm:$0x1]  ;;  %v25_v1 = vld [vmem:[%s379_s2 + $0x18] sm:$0x1]  ;;  %v22_v2 = vld [vmem:[%s379_s2] sm:$0xff]  ;;  %232 = vset.pattern.permute.xlu1 %v234_v3  ;;  %231 = vset.pattern.permute.xlu0 %v234_v3 }
   0x2   :  { %208 = vmatpush.msk.msra.mxu0 %vm99_vm0, %v24_v0  ;;  %226 = vmatpush.msk.msra.mxu2 %vm99_vm0, %v24_v0  ;;  %v23_v4 = vld [vmem:[%s379_s2 + $0x8] sm:$0xff]  ;;  %v14_v5 = vld [vmem:[%s380_s0] sm:$0xff]  ;;  %v28_v7 = vld [vmem:[%s381_s1 + $0x10] sm:$0xff] }
   0x3   :  { %217 = vmatpush.msk.msra.mxu1 %vm99_vm0, %v25_v1  ;;  %228 = vmatpush.msk.msra.mxu3 %vm99_vm0, %v25_v1  ;;  %v18_v6 = vld [vmem:[%s380_s0 + $0x20] sm:$0xff]  ;;  %v15_v10 = vld [vmem:[%s380_s0 + $0x8] sm:$0xff]  ;;  %v29_v12 = vld [vmem:[%s381_s1 + $0x18] sm:$0xff] }
   0x4   :  { %121 = vmatpush.msra.mxu0 %v22_v2  ;;  %227 = vmatpush.msra.mxu2 %v22_v2  ;;  %v26_v8 = vld [vmem:[%s381_s1] sm:$0xff]  ;;  %v19_v11 = vld [vmem:[%s380_s0 + $0x28] sm:$0xff]  ;;  %v16_v15 = vld [vmem:[%s380_s0 + $0x10] sm:$0xff] }
   0x5   :  { %162 = vmatpush.msra.mxu1 %v23_v4  ;;  %229 = vmatpush.msra.mxu3 %v23_v4  ;;  %v30_v9 = vld [vmem:[%s381_s1 + $0x20] sm:$0xff]  ;;  %v27_v13 = vld [vmem:[%s381_s1 + $0x8] sm:$0xff]  ;;  %v20_v16 = vld [vmem:[%s380_s0 + $0x30] sm:$0xff] }
   0x6   :  { %209 = vmatmul.msk.f32.vlgmr.msra.gmra.mxu0 %vm74_vm1, %v14_v5  ;;  %213 = vmatmul.msk.f32.vlgmr.msra.gmra.mxu2 %vm74_vm1, %v18_v6  ;;  %v31_v14 = vld [vmem:[%s381_s1 + $0x28] sm:$0xff]  ;;  %v33_v17 = vld [vmem:[%s381_s1 + $0x38] sm:$0xff]  ;;  %v32_v18 = vld [vmem:[%s381_s1 + $0x30] sm:$0xff] }
   0x7   :  { %218 = vmatmul.msk.f32.vlgmr.msra.gmra.mxu1 %vm74_vm1, %v14_v5  ;;  %222 = vmatmul.msk.f32.vlgmr.msra.gmra.mxu3 %vm74_vm1, %v18_v6  ;;  %v17_v19 = vld [vmem:[%s380_s0 + $0x18] sm:$0xff] }
   0x8   :  { %46 = vperm.xlu1 %232, %v28_v7   ;;  %36 = vperm.xlu0 %231, %v26_v8   ;;  %v21_v20 = vld [vmem:[%s380_s0 + $0x38] sm:$0xff] }
   0x9   :  { %233 = vset.pattern.permute.xlu2 %v234_v3 }
   0xa   :  { %56 = vperm.xlu2 %233, %v30_v9  }
   0xe   :  { %210 = vmatmul.msk.f32.gmra.mxu0 %vm74_vm1, %v15_v10  ;;  %214 = vmatmul.msk.f32.gmra.mxu2 %vm74_vm1, %v19_v11 }
   0xf   :  { %219 = vmatmul.msk.f32.gmra.mxu1 %vm74_vm1, %v15_v10  ;;  %223 = vmatmul.msk.f32.gmra.mxu3 %vm74_vm1, %v19_v11 }
  0x10   :  { %51 = vperm.xlu1 %232, %v29_v12   ;;  %41 = vperm.xlu0 %231, %v27_v13  }
  0x12   :  { %61 = vperm.xlu2 %233, %v31_v14  }
  0x16   :  { %211 = vmatmul.msk.f32.gmra.mxu0 %vm74_vm1, %v16_v15  ;;  %215 = vmatmul.msk.f32.gmra.mxu2 %vm74_vm1, %v20_v16 }
  0x17   :  { %220 = vmatmul.msk.f32.gmra.mxu1 %vm74_vm1, %v16_v15  ;;  %224 = vmatmul.msk.f32.gmra.mxu3 %vm74_vm1, %v20_v16 }
  0x18   :  { %71 = vperm.xlu1 %232, %v33_v17   ;;  %66 = vperm.xlu0 %231, %v32_v18  }
  0x1e   :  { %212 = vmatmul.msk.f32.gmra.mxu0 %vm74_vm1, %v17_v19  ;;  %216 = vmatmul.msk.f32.gmra.mxu2 %vm74_vm1, %v21_v20 }
  0x1f   :  { %221 = vmatmul.msk.f32.gmra.mxu1 %vm74_vm1, %v17_v19  ;;  %225 = vmatmul.msk.f32.gmra.mxu3 %vm74_vm1, %v21_v20 }
  0x64   :  { %v57_v26 = vpop.permute.xlu2 %56 }
  0x6c   :  { %v62_v37 = vpop.permute.xlu2 %61 }
  0x7a   :  { %v37_v21 = vpop.permute.xlu0 %36  ;;  %v47_v35 = vpop.permute.xlu1 %46 }
  0x82   :  { %v42_v30 = vpop.permute.xlu0 %41  ;;  %v52_v46 = vpop.permute.xlu1 %51 }
  0x83   :  { %v123_v22 = vpop.f32.mrf.mxu0 }
  0x84   :  { %v124_v23 = vadd.f32 %v123_v22, %v37_v21  ;;  %v164_v24 = vpop.f32.mrf.mxu1 }
  0x85   :  { %v165_v25 = vadd.f32 %v164_v24, %v37_v21 }
  0x86   :  { %188 = vst [vmem:[%s382_s3] sm:$0xff] %v124_v23 }
  0x87   :  { %189 = vst [vmem:[%s382_s3 + $0x8] sm:$0xff] %v165_v25 }
  0x89   :  { %v135_v27 = vpop.f32.mrf.mxu2 }
  0x8a   :  { %v136_v28 = vadd.f32 %v135_v27, %v57_v26  ;;  %v176_v29 = vpop.f32.mrf.mxu3  ;;  %v67_v47 = vpop.permute.xlu0 %66 }
  0x8b   :  { %v177_v31 = vadd.f32 %v176_v29, %v57_v26  ;;  %v126_v32 = vpop.f32.mrf.mxu0  ;;  %v72_v56 = vpop.permute.xlu1 %71 }
  0x8c   :  { %196 = vst [vmem:[%s382_s3 + $0x40] sm:$0xff] %v136_v28  ;;  %v127_v33 = vadd.f32 %v126_v32, %v42_v30  ;;  %v167_v34 = vpop.f32.mrf.mxu1 }
  0x8d   :  { %197 = vst [vmem:[%s382_s3 + $0x48] sm:$0xff] %v177_v31  ;;  %v168_v36 = vadd.f32 %v167_v34, %v42_v30 }
  0x8e   :  { %190 = vst [vmem:[%s382_s3 + $0x10] sm:$0xff] %v127_v33 }
  0x8f   :  { %191 = vst [vmem:[%s382_s3 + $0x18] sm:$0xff] %v168_v36 }
  0x91   :  { %v138_v38 = vpop.f32.mrf.mxu2 }
  0x92   :  { %v139_v39 = vadd.f32 %v138_v38, %v62_v37  ;;  %v179_v40 = vpop.f32.mrf.mxu3 }
  0x93   :  { %v180_v41 = vadd.f32 %v179_v40, %v62_v37  ;;  %v129_v42 = vpop.f32.mrf.mxu0 }
  0x94   :  { %198 = vst [vmem:[%s382_s3 + $0x50] sm:$0xff] %v139_v39  ;;  %v130_v43 = vadd.f32 %v129_v42, %v47_v35  ;;  %v170_v44 = vpop.f32.mrf.mxu1 }
  0x95   :  { %199 = vst [vmem:[%s382_s3 + $0x58] sm:$0xff] %v180_v41  ;;  %v171_v45 = vadd.f32 %v170_v44, %v47_v35 }
  0x96   :  { %192 = vst [vmem:[%s382_s3 + $0x20] sm:$0xff] %v130_v43 }
  0x97   :  { %193 = vst [vmem:[%s382_s3 + $0x28] sm:$0xff] %v171_v45 }
  0x99   :  { %v141_v48 = vpop.f32.mrf.mxu2 }
  0x9a   :  { %v142_v49 = vadd.f32 %v141_v48, %v67_v47  ;;  %v182_v50 = vpop.f32.mrf.mxu3 }
  0x9b   :  { %v183_v51 = vadd.f32 %v182_v50, %v67_v47  ;;  %v132_v52 = vpop.f32.mrf.mxu0 }
  0x9c   :  { %200 = vst [vmem:[%s382_s3 + $0x60] sm:$0xff] %v142_v49  ;;  %v133_v53 = vadd.f32 %v132_v52, %v52_v46  ;;  %v173_v54 = vpop.f32.mrf.mxu1 }
  0x9d   :  { %201 = vst [vmem:[%s382_s3 + $0x68] sm:$0xff] %v183_v51  ;;  %v174_v55 = vadd.f32 %v173_v54, %v52_v46 }
  0x9e   :  { %194 = vst [vmem:[%s382_s3 + $0x30] sm:$0xff] %v133_v53 }
  0x9f   :  { %195 = vst [vmem:[%s382_s3 + $0x38] sm:$0xff] %v174_v55 }
  0xa1   :  { %v144_v57 = vpop.f32.mrf.mxu2 }
  0xa2   :  { %v145_v58 = vadd.f32 %v144_v57, %v72_v56  ;;  %v185_v59 = vpop.f32.mrf.mxu3 }
  0xa3   :  { %v186_v60 = vadd.f32 %v185_v59, %v72_v56 }
  0xa4   :  { %202 = vst [vmem:[%s382_s3 + $0x70] sm:$0xff] %v145_v58 }
  0xa5   :  { %203 = vst [vmem:[%s382_s3 + $0x78] sm:$0xff] %v186_v60 }

</bundles_post_ra>
